<compile_context>
chip_gen: v7x
topology: tpu7x:2x2x1
jax: 0.10.0
libtpu: 0.0.40
codegen_flags: <defaults>
</compile_context>

<pallas_src>
import functools

import jax
import jax.numpy as jnp
from jax.experimental import pallas as pl
from jax.experimental.pallas import tpu as pltpu


HIDDEN = 512                 # hidden width of the classifier (fixed by the module)
OUT_LANES = 128              # logits padded to a full lane width; column 0 is the real output
RESIDENT_K_MAX = 8192        # Kp up to this -> W1 kept VMEM-resident (<= 8 MiB bf16)
STREAM_TK = 2048             # K tile when W1 must be streamed from HBM
VMEM_LIMIT = 48 * 1024 * 1024  # fits resident W1 + big x tiles; < v7x's 64 MiB physical


def _round_up(x, m):
    return ((x + m - 1) // m) * m


def _choose_tm(batch, cap):
    """Pick an M tile: whole (8-padded) batch if small, else a big tile with <=25% pad waste."""
    cap = max(8, (cap // 8) * 8)
    mp0 = _round_up(batch, 8)
    if mp0 <= cap:
        return mp0
    tm = cap
    while tm > 128 and (_round_up(batch, tm) - batch) * 4 > batch:
        tm //= 2
    return max(tm, 8)


# ------------------------------------------------------------------
# Fused kernels: x @ W1 (+b1) -> LeakyReLU(0.2) -> @ W2 (+b2) -> sigmoid
# ------------------------------------------------------------------

def _disc_kernel_resident(x_ref, w1_ref, b1_ref, w2_ref, b2_ref, o_ref, *, slope):
    """Whole-K path: W1 is VMEM-resident, single dot per M tile, no accumulator."""
    h = jnp.dot(x_ref[...], w1_ref[...],
                preferred_element_type=jnp.float32) + b1_ref[...]
    h = jnp.where(h >= 0, h, slope * h)                     # LeakyReLU(0.2)
    logits = jnp.dot(h.astype(w2_ref.dtype), w2_ref[...],
                     preferred_element_type=jnp.float32) + b2_ref[...]
    o_ref[...] = jax.nn.sigmoid(logits)                     # lane-dense final store


def _disc_kernel_streamk(x_ref, w1_ref, b1_ref, w2_ref, b2_ref, o_ref, h_acc, *, slope):
    """Streamed-K path for very large in_features: W1 arrives in (tk, 512) tiles."""
    k = pl.program_id(1)

    @pl.when(k == 0)
    def _():
        # Bias-initialize the accumulator (saves a separate +b1 pass in the epilogue).
        h_acc[...] = jnp.broadcast_to(b1_ref[...], h_acc.shape)

    # Linear-1 partial product: bf16 operands, f32 accumulation on the MXU.
    h_acc[...] += jnp.dot(x_ref[...], w1_ref[...],
                          preferred_element_type=jnp.float32)

    @pl.when(k == pl.num_programs(1) - 1)
    def _():
        h = h_acc[...]
        h = jnp.where(h >= 0, h, slope * h)                 # LeakyReLU(0.2)
        logits = jnp.dot(h.astype(w2_ref.dtype), w2_ref[...],
                         preferred_element_type=jnp.float32) + b2_ref[...]
        o_ref[...] = jax.nn.sigmoid(logits)


def disc_pallas(x2d, params, *, force_stream_tk=None):
    """x2d: (B, K) array (any float dtype). Returns (B,) f32 probabilities."""
    w1, b1, w2, b2 = params["w1"], params["b1"], params["w2"], params["b2"]
    Kp = w1.shape[0]                         # K was padded at init time
    B, K = x2d.shape
    assert K <= Kp

    # Single cast to bf16 (no f32 round trip), pads only when needed.
    x = x2d if x2d.dtype == jnp.bfloat16 else x2d.astype(jnp.bfloat16)
    if K < Kp:                               # zero-pad features (matches zero-padded W1 rows)
        x = jnp.pad(x, ((0, 0), (0, Kp - K)))

    stream = (Kp > RESIDENT_K_MAX) or (force_stream_tk is not None)

    if stream:
        tk = force_stream_tk if force_stream_tk is not None else STREAM_TK
        assert Kp % tk == 0
        tm = _choose_tm(B, 512)
    else:
        # Budget the x block so that double-buffered (tm, Kp) bf16 stays around ~12 MiB.
        cap = min(512, (12 * 1024 * 1024) // (4 * Kp))
        tm = _choose_tm(B, cap)

    Mp = _round_up(B, tm)
    if Mp > B:
        x = jnp.pad(x, ((0, Mp - B), (0, 0)))

    if not stream:
        # --------- resident-W1 path: grid over M only, one full-K dot per tile ----------
        out = pl.pallas_call(
            functools.partial(_disc_kernel_resident, slope=0.2),
            out_shape=jax.ShapeDtypeStruct((Mp, OUT_LANES), jnp.float32),
            grid_spec=pltpu.PrefetchScalarGridSpec(
                num_scalar_prefetch=0,
                grid=(Mp // tm,),
                in_specs=[
                    pl.BlockSpec((tm, Kp), lambda i: (i, 0)),            # activations
                    pl.BlockSpec((Kp, HIDDEN), lambda i: (0, 0)),        # W1 (resident)
                    pl.BlockSpec((1, HIDDEN), lambda i: (0, 0)),         # b1 (resident)
                    pl.BlockSpec((HIDDEN, OUT_LANES), lambda i: (0, 0)),  # W2 (resident)
                    pl.BlockSpec((1, OUT_LANES), lambda i: (0, 0)),      # b2 (resident)
                ],
                out_specs=pl.BlockSpec((tm, OUT_LANES), lambda i: (i, 0)),
            ),
            compiler_params=pltpu.CompilerParams(
                dimension_semantics=("parallel",),
                vmem_limit_bytes=VMEM_LIMIT,
            ),
        )(x, w1, b1, w2, b2)
    else:
        # --------- streamed-K path: (M tiles, K tiles) with f32 accumulator ----------
        out = pl.pallas_call(
            functools.partial(_disc_kernel_streamk, slope=0.2),
            out_shape=jax.ShapeDtypeStruct((Mp, OUT_LANES), jnp.float32),
            grid_spec=pltpu.PrefetchScalarGridSpec(
                num_scalar_prefetch=0,
                grid=(Mp // tm, Kp // tk),
                in_specs=[
                    pl.BlockSpec((tm, tk), lambda i, k: (i, k)),            # activations
                    pl.BlockSpec((tk, HIDDEN), lambda i, k: (k, 0)),        # W1 (streamed)
                    pl.BlockSpec((1, HIDDEN), lambda i, k: (0, 0)),         # b1
                    pl.BlockSpec((HIDDEN, OUT_LANES), lambda i, k: (0, 0)),  # W2
                    pl.BlockSpec((1, OUT_LANES), lambda i, k: (0, 0)),      # b2
                ],
                out_specs=pl.BlockSpec((tm, OUT_LANES), lambda i, k: (i, 0)),
                scratch_shapes=[pltpu.VMEM((tm, HIDDEN), jnp.float32)],     # Linear-1 acc
            ),
            compiler_params=pltpu.CompilerParams(
                dimension_semantics=("parallel", "arbitrary"),
                vmem_limit_bytes=VMEM_LIMIT,
            ),
        )(x, w1, b1, w2, b2)

    return out[:B, 0]


# ------------------------------------------------------------------
# Disc module: parameters + forward
# ------------------------------------------------------------------

def init_disc_params(key, sep, size):
    """Build parameters (PyTorch-style Linear init), pre-laid-out for the kernel."""
    in_features = (512 - sep) * size * size
    k1, k2, k3, k4 = jax.random.split(key, 4)

    bound1 = in_features ** -0.5
    w1 = jax.random.uniform(k1, (in_features, HIDDEN), jnp.float32, -bound1, bound1)
    b1 = jax.random.uniform(k2, (HIDDEN,), jnp.float32, -bound1, bound1)
    bound2 = HIDDEN ** -0.5
    w2 = jax.random.uniform(k3, (HIDDEN, 1), jnp.float32, -bound2, bound2)
    b2 = jax.random.uniform(k4, (1,), jnp.float32, -bound2, bound2)

    # Hoist layout work to init: pad K to the kernel's tile multiple, cast weights to
    # bf16 once, pad the tiny (512,1) second layer to a full 128-lane block.
    if in_features <= RESIDENT_K_MAX:
        kpad = _round_up(in_features, 128)      # resident-W1 path
    else:
        kpad = _round_up(in_features, STREAM_TK)  # streamed path
    w1p = jnp.zeros((kpad, HIDDEN), jnp.bfloat16).at[:in_features, :].set(
        w1.astype(jnp.bfloat16))
    w2p = jnp.zeros((HIDDEN, OUT_LANES), jnp.bfloat16).at[:, :1].set(
        w2.astype(jnp.bfloat16))
    b2p = jnp.zeros((1, OUT_LANES), jnp.float32).at[0, 0].set(b2[0])

    return dict(w1=w1p, b1=b1.reshape(1, HIDDEN), w2=w2p, b2=b2p,
                in_features=in_features)


def disc_forward(params, net):
    """net: any shape viewable as (-1, (512-sep)*size*size). Returns (B,)."""
    x = net.reshape(-1, params["in_features"]).astype(jnp.bfloat16)   # single cast
    return disc_pallas(x, params)


def _reference_forward(params, net):
    """Plain-JAX reference with the same (bf16) weights, for a sanity check."""
    x = net.reshape(-1, params["in_features"]).astype(jnp.bfloat16)
    w1 = params["w1"][:x.shape[1], :]
    h = jnp.dot(x, w1, preferred_element_type=jnp.float32) + params["b1"]
    h = jnp.where(h >= 0, h, 0.2 * h)
    logits = jnp.dot(h.astype(jnp.bfloat16), params["w2"],
                     preferred_element_type=jnp.float32) + params["b2"]
    return jax.nn.sigmoid(logits)[:, 0]


# ------------------------------------------------------------------
# main
# ------------------------------------------------------------------

if __name__ == "__main__":
    key = jax.random.PRNGKey(0)

    # Config 1: small in_features (resident W1, single grid step), batch not multiple of 8.
    sep, size, batch = 256, 2, 4                 # K = (512-256)*2*2 = 1024
    kp, kn, key = jax.random.split(key, 3)
    params = init_disc_params(kp, sep, size)
    net = jax.random.normal(kn, (batch, 512 - sep, size, size), jnp.float32)

    out = jax.block_until_ready(disc_forward(params, net))
    assert out.shape == (batch,)
    assert bool(jnp.all(jnp.isfinite(out)))
    assert bool(jnp.all((out >= 0.0) & (out <= 1.0)))
    ref = _reference_forward(params, net)
    assert jnp.allclose(out, ref, atol=2e-2, rtol=2e-2)

    # Config 2: larger in_features, still resident-W1 (K = 8192 -> 8 MiB bf16 on-chip).
    sep2, size2, batch2 = 0, 4, 3                # K = 512*4*4 = 8192
    kp2, kn2, _ = jax.random.split(key, 3)
    params2 = init_disc_params(kp2, sep2, size2)
    net2 = jax.random.normal(kn2, (batch2, 512 - sep2, size2, size2), jnp.float32)

    out2 = jax.block_until_ready(disc_forward(params2, net2))
    assert out2.shape == (batch2,)
    ref2 = _reference_forward(params2, net2)
    assert jnp.allclose(out2, ref2, atol=2e-2, rtol=2e-2)

    # Config 3: same data, but force the streamed-K reduction path (exercises the
    # accumulator / pl.when phases that only trigger for K > RESIDENT_K_MAX).
    x2 = net2.reshape(-1, params2["in_features"]).astype(jnp.bfloat16)
    out2s = jax.block_until_ready(disc_pallas(x2, params2, force_stream_tk=2048))
    assert out2s.shape == (batch2,)
    assert jnp.allclose(out2s, ref2, atol=2e-2, rtol=2e-2)

    print("KERNEL_OK")
</pallas_src>

<mosaic_0001>
module attributes {stable_mosaic.version = 11 : i64} {
  func.func @_disc_kernel_resident(%arg0: i32, %arg1: memref<8x1024xbf16, #tpu.memory_space<vmem>>, %arg2: memref<1024x512xbf16, #tpu.memory_space<vmem>>, %arg3: memref<1x512xf32, #tpu.memory_space<vmem>>, %arg4: memref<512x128xbf16, #tpu.memory_space<vmem>>, %arg5: memref<1x128xf32, #tpu.memory_space<vmem>>, %arg6: memref<8x128xf32, #tpu.memory_space<vmem>>) attributes {dimension_semantics = [#tpu.dimension_semantics<parallel>], iteration_bounds = array<i64: 1>, scalar_prefetch = 0 : i64, scratch_operands = 0 : i64, tpu.core_type = #tpu.core_type<tc>, window_params = [{transform_indices = @transform_0, window_bounds = array<i64: 8, 1024>}, {pipeline_mode = #tpu.pipeline_mode<synchronous>, transform_indices = @transform_1, window_bounds = array<i64: 1024, 512>}, {pipeline_mode = #tpu.pipeline_mode<synchronous>, transform_indices = @transform_2, window_bounds = array<i64: 1, 512>}, {pipeline_mode = #tpu.pipeline_mode<synchronous>, transform_indices = @transform_3, window_bounds = array<i64: 512, 128>}, {pipeline_mode = #tpu.pipeline_mode<synchronous>, transform_indices = @transform_4, window_bounds = array<i64: 1, 128>}, {transform_indices = @transform_5, window_bounds = array<i64: 8, 128>}]} {
    %c0 = arith.constant 0 : index
    %c0_0 = arith.constant 0 : index
    %0 = vector.load %arg1[%c0, %c0_0] : memref<8x1024xbf16, #tpu.memory_space<vmem>>, vector<8x1024xbf16>
    %c0_1 = arith.constant 0 : index
    %c0_2 = arith.constant 0 : index
    %1 = vector.load %arg2[%c0_1, %c0_2] : memref<1024x512xbf16, #tpu.memory_space<vmem>>, vector<1024x512xbf16>
    %cst = arith.constant dense<0.000000e+00> : vector<8x512xf32>
    %2 = tpu.matmul %0, %1, %cst {dimension_numbers = #tpu.dot_dimension_numbers<[1], [0], [0], [1], [0, 0, 1, 1], [], []>} : vector<8x1024xbf16>, vector<1024x512xbf16>, vector<8x512xf32> -> vector<8x512xf32>
    %c0_3 = arith.constant 0 : index
    %c0_4 = arith.constant 0 : index
    %3 = vector.load %arg3[%c0_3, %c0_4] : memref<1x512xf32, #tpu.memory_space<vmem>>, vector<1x512xf32>
    %4 = vector.broadcast %3 : vector<1x512xf32> to vector<8x512xf32>
    %5 = arith.addf %2, %4 : vector<8x512xf32>
    %cst_5 = arith.constant 0.000000e+00 : f32
    %6 = vector.broadcast %cst_5 : f32 to vector<8x512xf32>
    %7 = arith.cmpf oge, %5, %6 : vector<8x512xf32>
    %cst_6 = arith.constant 2.000000e-01 : f32
    %8 = vector.broadcast %cst_6 : f32 to vector<8x512xf32>
    %9 = arith.mulf %8, %5 : vector<8x512xf32>
    %10 = arith.select %7, %5, %9 : vector<8x512xi1>, vector<8x512xf32>
    %11 = arith.truncf %10 : vector<8x512xf32> to vector<8x512xbf16>
    %c0_7 = arith.constant 0 : index
    %c0_8 = arith.constant 0 : index
    %12 = vector.load %arg4[%c0_7, %c0_8] : memref<512x128xbf16, #tpu.memory_space<vmem>>, vector<512x128xbf16>
    %cst_9 = arith.constant dense<0.000000e+00> : vector<8x128xf32>
    %13 = tpu.matmul %11, %12, %cst_9 {dimension_numbers = #tpu.dot_dimension_numbers<[1], [0], [0], [1], [0, 0, 1, 1], [], []>} : vector<8x512xbf16>, vector<512x128xbf16>, vector<8x128xf32> -> vector<8x128xf32>
    %c0_10 = arith.constant 0 : index
    %c0_11 = arith.constant 0 : index
    %14 = vector.load %arg5[%c0_10, %c0_11] : memref<1x128xf32, #tpu.memory_space<vmem>>, vector<1x128xf32>
    %15 = vector.broadcast %14 : vector<1x128xf32> to vector<8x128xf32>
    %16 = arith.addf %13, %15 : vector<8x128xf32>
    %17 = arith.negf %16 : vector<8x128xf32>
    %18 = math.exp %17 : vector<8x128xf32>
    %cst_12 = arith.constant 1.000000e+00 : f32
    %19 = vector.broadcast %cst_12 : f32 to vector<8x128xf32>
    %20 = arith.addf %19, %18 : vector<8x128xf32>
    %21 = arith.divf %19, %20 : vector<8x128xf32>
    %c0_13 = arith.constant 0 : index
    %c0_14 = arith.constant 0 : index
    %22 = vector.load %arg6[%c0_13, %c0_14] : memref<8x128xf32, #tpu.memory_space<vmem>>, vector<8x128xf32>
    tpu.vector_store %arg6[%c0_13, %c0_14], %21 {strides = array<i32>} : memref<8x128xf32, #tpu.memory_space<vmem>>, vector<8x128xf32>,
    return
  }
  func.func @transform_0(%arg0: i32) -> (i32, i32) {
    %c0_i32 = arith.constant 0 : i32
    %c0_i32_0 = arith.constant 0 : i32
    return %arg0, %c0_i32 : i32, i32
  }
  func.func @transform_1(%arg0: i32) -> (i32, i32) {
    %c0_i32 = arith.constant 0 : i32
    %c0_i32_0 = arith.constant 0 : i32
    %c0_i32_1 = arith.constant 0 : i32
    return %c0_i32, %c0_i32_0 : i32, i32
  }
  func.func @transform_2(%arg0: i32) -> (i32, i32) {
    %c0_i32 = arith.constant 0 : i32
    %c0_i32_0 = arith.constant 0 : i32
    %c0_i32_1 = arith.constant 0 : i32
    return %c0_i32, %c0_i32_0 : i32, i32
  }
  func.func @transform_3(%arg0: i32) -> (i32, i32) {
    %c0_i32 = arith.constant 0 : i32
    %c0_i32_0 = arith.constant 0 : i32
    %c0_i32_1 = arith.constant 0 : i32
    return %c0_i32, %c0_i32_0 : i32, i32
  }
  func.func @transform_4(%arg0: i32) -> (i32, i32) {
    %c0_i32 = arith.constant 0 : i32
    %c0_i32_0 = arith.constant 0 : i32
    %c0_i32_1 = arith.constant 0 : i32
    return %c0_i32, %c0_i32_0 : i32, i32
  }
  func.func @transform_5(%arg0: i32) -> (i32, i32) {
    %c0_i32 = arith.constant 0 : i32
    %c0_i32_0 = arith.constant 0 : i32
    return %arg0, %c0_i32 : i32, i32
  }
}

</mosaic_0001>

<bundles_post_ra>
// kernel: tpu_custom_call.1
= control target key start
LH: loop header
LB: loop body
LE: loop exit
PB: predicated region body
PF: predicated region fallthrough
CT: control target
= control target key end

     0   :  { %10 = vsyncpa [#allocation3], 0  ;;  %s3371_s0 = inlined_call_operand.hbm [shape: bf16[8,1024], index: 0, kind: input, shape index: {}]   ;;  %s3372_s1 = inlined_call_operand.hbm [shape: bf16[1024,512], index: 1, kind: input, shape index: {}]   ;;  %s3373_s2 = inlined_call_operand.vmem [shape: f32[1,512], index: 2, kind: input, shape index: {}]   ;;  %s3374_s3 = inlined_call_operand.hbm [shape: bf16[512,128], index: 3, kind: input, shape index: {}]   ;;  %s3375_s4 = inlined_call_operand.vmem [shape: f32[1,128], index: 4, kind: input, shape index: {}]   ;;  %s3376_s5 = inlined_call_operand.hbm [shape: f32[8,128], index: 5, kind: output, shape index: {}]  }
   0x1   :  { %11 = vsyncpa [#allocation6], 0 }
   0x2   :  { %12 = vsyncpa [#allocation4], 0  ;;  %s3261_s18 = smov [#allocation5]   ;;  %s3167_s22 = scalar_lea.hbm %s3372_s1, 32768 }
   0x3   :  { %s28_s19 = sshll.u32 %s3261_s18, 4  ;;  %p3168_p0 = scmp.ne.s32.totalorder %s3372_s1, %s3167_s22  ;;  %s29_s19 = int_to_ptr.vmem [resolvable:$true] %s28_s19 }
   0x4   :  { %p3171_p1 = scmp.lt.u32.totalorder %s3167_s22, %s3372_s1 }
   0x6   :  { %p3173_p2 = pnand %p3171_p1, %p3168_p0 }
   0x8   :  { %3176 = shalt.err (!%p3173_p2)
}
   0x9   :  { %s3177_s27 = scalar_lea.vmem %s29_s19, 32768  ;;  %p3182_p4 = scmp.lt.s32.totalorder %s29_s19, %s29_s19 }
   0xa   :  { %p3178_p3 = scmp.ne.s32.totalorder %s29_s19, %s3177_s27  ;;  %p3183_p5 = scmp.lt.s32.totalorder %s3177_s27, %s3177_s27 }
   0xc   :  { %p3184_p6 = por %p3183_p5, %p3182_p4 }
   0xe   :  { %p3185_p7 = pnand %p3184_p6, %p3178_p3 }
  0x10   :  { %3188 = shalt.err (!%p3185_p7)
}
  0x11   :  { %s3262_s28 = smov 256   ;;  %s3263_s29 = smov 16  }
  0x12   :  { %34 = dma.hbm_to_vmem [thread:$0]  %s3372_s1, 32768, %s29_s19, [#allocation6], %s3262_s28, %s3262_s28, %s3263_s29  }
  0x13   :  { %s3264_s7 = smov [#allocation2]   ;;  %s3265_s9 = smov [#allocation7]  }
  0x14   :  { %s19_s8 = sshll.u32 %s3264_s7, 4  ;;  %s42_s10 = sshll.u32 %s3265_s9, 4  ;;  %s20_s8 = int_to_ptr.vmem [resolvable:$true] %s19_s8  ;;  %s43_s10 = int_to_ptr.vmem [resolvable:$true] %s42_s10 }
  0x15   :  { %s3189_s13 = scalar_lea.hbm %s3371_s0, 512 }
  0x16   :  { %p3190_p8 = scmp.ne.s32.totalorder %s3371_s0, %s3189_s13  ;;  %p3193_p9 = scmp.lt.u32.totalorder %s3189_s13, %s3371_s0 }
  0x18   :  { %p3195_p10 = pnand %p3193_p9, %p3190_p8 }
  0x1a   :  { %3198 = shalt.err (!%p3195_p10)
}
  0x1b   :  { %s3199_s1 = scalar_lea.vmem %s20_s8, 512  ;;  %p3204_p12 = scmp.lt.s32.totalorder %s20_s8, %s20_s8 }
  0x1c   :  { %p3200_p11 = scmp.ne.s32.totalorder %s20_s8, %s3199_s1  ;;  %p3205_p13 = scmp.lt.s32.totalorder %s3199_s1, %s3199_s1 }
  0x1e   :  { %p3206_p0 = por %p3205_p13, %p3204_p12 }
  0x20   :  { %p3207_p1 = pnand %p3206_p0, %p3200_p11 }
  0x22   :  { %3210 = shalt.err (!%p3207_p1)
}
  0x23   :  { %22 = dma.hbm_to_vmem [thread:$0]  %s3371_s0, 512, %s20_s8, [#allocation3]  }
  0x24   :  { %s3211_s22 = scalar_lea.hbm %s3374_s3, 4096 }
  0x25   :  { %p3212_p2 = scmp.ne.s32.totalorder %s3374_s3, %s3211_s22  ;;  %p3215_p3 = scmp.lt.u32.totalorder %s3211_s22, %s3374_s3 }
  0x27   :  { %p3217_p4 = pnand %p3215_p3, %p3212_p2 }
  0x29   :  { %3220 = shalt.err (!%p3217_p4)
}
  0x2a   :  { %s3221_s27 = scalar_lea.vmem %s43_s10, 4096  ;;  %p3226_p6 = scmp.lt.s32.totalorder %s43_s10, %s43_s10 }
  0x2b   :  { %p3222_p5 = scmp.ne.s32.totalorder %s43_s10, %s3221_s27  ;;  %p3227_p7 = scmp.lt.s32.totalorder %s3221_s27, %s3221_s27 }
  0x2d   :  { %p3228_p8 = por %p3227_p7, %p3226_p6 }
  0x2f   :  { %p3229_p9 = pnand %p3228_p8, %p3222_p5 }
  0x31   :  { %3232 = shalt.err (!%p3229_p9)
}
  0x32   :  { %s3266_s0 = smov 64   ;;  %s3267_s28 = smov 4  }
  0x33   :  { %48 = dma.hbm_to_vmem [thread:$0]  %s3374_s3, 4096, %s43_s10, [#allocation6], %s3266_s0, %s3266_s0, %s3267_s28  }
  0x34   :  { %3255 = dma.done.wait [#allocation3], 512  }
  0x35   :  { %3256 = vsyncadd [#allocation3], 4294966784 }
  0x36   :  { %3257 = dma.done.wait [#allocation6], 36864  }
  0x37   :  { %3258 = vsyncadd [#allocation6], 4294930432  ;;  %v2739_v0 = vld [vmem:[#allocation5 + $0x4] ss:$16 sps:$4 sm:$0xff]   ;;  %v2741_v1 = vld [vmem:[#allocation5 + $0xc] ss:$16 sps:$4 sm:$0xff]  }
  0x38   :  { %1651 = vmatprep.subr.bf16.mxu0 %v2739_v0  ;;  %v2743_v2 = vld [vmem:[#allocation5] ss:$16 sps:$4 sm:$0xff]   ;;  %v2744_v3 = vld [vmem:[#allocation5 + $0x8] ss:$16 sps:$4 sm:$0xff]   ;;  %1815 = vmatprep.subr.bf16.mxu1 %v2741_v1  ;;  %v2745_v4 = vld [vmem:[#allocation5 + $0x24] ss:$16 sps:$4 sm:$0xff]  }
  0x39   :  { %1652 = vmatpush1.bf16.msra.mxu0 %v2743_v2  ;;  %1816 = vmatpush1.bf16.msra.mxu1 %v2744_v3  ;;  %v2747_v5 = vld [vmem:[#allocation5 + $0x2c] ss:$16 sps:$4 sm:$0xff]   ;;  %v2749_v6 = vld [vmem:[#allocation5 + $0x20] ss:$16 sps:$4 sm:$0xff]   ;;  %v2750_v7 = vld [vmem:[#allocation5 + $0x28] ss:$16 sps:$4 sm:$0xff]  }
  0x3a   :  { %1653 = vmatprep.subr.bf16.mxu0 %v2745_v4  ;;  %1817 = vmatprep.subr.bf16.mxu1 %v2747_v5  ;;  %v2751_v8 = vld [vmem:[#allocation5 + $0x44] ss:$16 sps:$4 sm:$0xff]   ;;  %v2753_v9 = vld [vmem:[#allocation5 + $0x4c] ss:$16 sps:$4 sm:$0xff]   ;;  %v2755_v10 = vld [vmem:[#allocation5 + $0x40] ss:$16 sps:$4 sm:$0xff]  }
  0x3b   :  { %v2756_v11 = vld [vmem:[#allocation5 + $0x48] ss:$16 sps:$4 sm:$0xff]   ;;  %v2757_v12 = vld [vmem:[#allocation5 + $0x64] ss:$16 sps:$4 sm:$0xff]   ;;  %v2759_v13 = vld [vmem:[#allocation5 + $0x6c] ss:$16 sps:$4 sm:$0xff]  }
  0x3c   :  { %v2761_v14 = vld [vmem:[#allocation5 + $0x60] ss:$16 sps:$4 sm:$0xff]   ;;  %v2762_v15 = vld [vmem:[#allocation5 + $0x68] ss:$16 sps:$4 sm:$0xff]   ;;  %v2763_v16 = vld [vmem:[#allocation5 + $0x84] ss:$16 sps:$4 sm:$0xff]  }
  0x3d   :  { %1654 = vmatpush1.bf16.msra.mxu0 %v2749_v6  ;;  %1818 = vmatpush1.bf16.msra.mxu1 %v2750_v7  ;;  %v2765_v17 = vld [vmem:[#allocation5 + $0x8c] ss:$16 sps:$4 sm:$0xff]   ;;  %v2767_v18 = vld [vmem:[#allocation5 + $0x80] ss:$16 sps:$4 sm:$0xff]   ;;  %v2768_v19 = vld [vmem:[#allocation5 + $0x88] ss:$16 sps:$4 sm:$0xff]  }
  0x3e   :  { %1655 = vmatprep.subr.bf16.mxu0 %v2751_v8  ;;  %1819 = vmatprep.subr.bf16.mxu1 %v2753_v9  ;;  %v2769_v20 = vld [vmem:[#allocation5 + $0xa4] ss:$16 sps:$4 sm:$0xff]   ;;  %v2771_v21 = vld [vmem:[#allocation5 + $0xac] ss:$16 sps:$4 sm:$0xff]   ;;  %v2773_v22 = vld [vmem:[#allocation5 + $0xa0] ss:$16 sps:$4 sm:$0xff]  }
  0x3f   :  { %v2774_v23 = vld [vmem:[#allocation5 + $0xa8] ss:$16 sps:$4 sm:$0xff]   ;;  %v2775_v24 = vld [vmem:[#allocation5 + $0xc4] ss:$16 sps:$4 sm:$0xff]   ;;  %v2777_v25 = vld [vmem:[#allocation5 + $0xcc] ss:$16 sps:$4 sm:$0xff]  }
  0x40   :  { %v2779_v26 = vld [vmem:[#allocation5 + $0xc0] ss:$16 sps:$4 sm:$0xff]   ;;  %v2780_v27 = vld [vmem:[#allocation5 + $0xc8] ss:$16 sps:$4 sm:$0xff]   ;;  %v2781_v28 = vld [vmem:[#allocation5 + $0xe4] ss:$16 sps:$4 sm:$0xff]  }
  0x41   :  { %1656 = vmatpush1.bf16.msra.mxu0 %v2755_v10  ;;  %1820 = vmatpush1.bf16.msra.mxu1 %v2756_v11  ;;  %v2783_v29 = vld [vmem:[#allocation5 + $0xec] ss:$16 sps:$4 sm:$0xff]   ;;  %v2785_v30 = vld [vmem:[#allocation5 + $0xe0] ss:$16 sps:$4 sm:$0xff]   ;;  %v2786_v31 = vld [vmem:[#allocation5 + $0xe8] ss:$16 sps:$4 sm:$0xff]  }
  0x42   :  { %1657 = vmatprep.subr.bf16.mxu0 %v2757_v12  ;;  %1821 = vmatprep.subr.bf16.mxu1 %v2759_v13  ;;  %v2787_v32 = vld [vmem:[#allocation5 + $0x104] ss:$16 sps:$4 sm:$0xff]   ;;  %v2789_v33 = vld [vmem:[#allocation5 + $0x10c] ss:$16 sps:$4 sm:$0xff]   ;;  %v2791_v34 = vld [vmem:[#allocation5 + $0x100] ss:$16 sps:$4 sm:$0xff]  }
  0x43   :  { %v2792_v35 = vld [vmem:[#allocation5 + $0x108] ss:$16 sps:$4 sm:$0xff]   ;;  %v2793_v36 = vld [vmem:[#allocation5 + $0x124] ss:$16 sps:$4 sm:$0xff]   ;;  %v2795_v37 = vld [vmem:[#allocation5 + $0x12c] ss:$16 sps:$4 sm:$0xff]  }
  0x44   :  { %v2797_v38 = vld [vmem:[#allocation5 + $0x120] ss:$16 sps:$4 sm:$0xff]   ;;  %v2798_v39 = vld [vmem:[#allocation5 + $0x128] ss:$16 sps:$4 sm:$0xff]   ;;  %v2799_v40 = vld [vmem:[#allocation5 + $0x144] ss:$16 sps:$4 sm:$0xff]  }
  0x45   :  { %1658 = vmatpush1.bf16.msra.mxu0 %v2761_v14  ;;  %1822 = vmatpush1.bf16.msra.mxu1 %v2762_v15  ;;  %v2801_v41 = vld [vmem:[#allocation5 + $0x14c] ss:$16 sps:$4 sm:$0xff]   ;;  %v2803_v42 = vld [vmem:[#allocation5 + $0x140] ss:$16 sps:$4 sm:$0xff]   ;;  %v2804_v43 = vld [vmem:[#allocation5 + $0x148] ss:$16 sps:$4 sm:$0xff]  }
  0x46   :  { %1659 = vmatprep.subr.bf16.mxu0 %v2763_v16  ;;  %1823 = vmatprep.subr.bf16.mxu1 %v2765_v17  ;;  %v2805_v44 = vld [vmem:[#allocation5 + $0x164] ss:$16 sps:$4 sm:$0xff]   ;;  %v2807_v45 = vld [vmem:[#allocation5 + $0x16c] ss:$16 sps:$4 sm:$0xff]   ;;  %v2809_v47 = vld [vmem:[#allocation5 + $0x160] ss:$16 sps:$4 sm:$0xff]  }
  0x47   :  { %v61_v46 = vld [vmem:[#allocation2] sm:$0xff]  ;;  %v2810_v49 = vld [vmem:[#allocation5 + $0x168] ss:$16 sps:$4 sm:$0xff]   ;;  %v2813_v51 = vld [vmem:[#allocation5 + $0x18c] ss:$16 sps:$4 sm:$0xff]   ;;  %s3268_s8 = smov [#allocation8]  }
  0x48   :  { %v2362_v48 = vcombine.high %v61_v46, %v61_v46  ;;  %v2811_v50 = vld [vmem:[#allocation5 + $0x184] ss:$16 sps:$4 sm:$0xff]   ;;  %v2815_v52 = vld [vmem:[#allocation5 + $0x180] ss:$16 sps:$4 sm:$0xff]   ;;  %v2816_v53 = vld [vmem:[#allocation5 + $0x188] ss:$16 sps:$4 sm:$0xff]   ;;  %v2361_v4 = vcombine.low %v61_v46, %v61_v46 }
  0x49   :  { %1660 = vmatpush1.bf16.msra.mxu0 %v2767_v18  ;;  %1824 = vmatpush1.bf16.msra.mxu1 %v2768_v19  ;;  %v2817_v54 = vld [vmem:[#allocation5 + $0x1a4] ss:$16 sps:$4 sm:$0xff]   ;;  %v2819_v55 = vld [vmem:[#allocation5 + $0x1ac] ss:$16 sps:$4 sm:$0xff]   ;;  %v2821_v56 = vld [vmem:[#allocation5 + $0x1a0] ss:$16 sps:$4 sm:$0xff]  }
  0x4a   :  { %1661 = vmatprep.subr.bf16.mxu0 %v2769_v20  ;;  %1825 = vmatprep.subr.bf16.mxu1 %v2771_v21  ;;  %v2822_v57 = vld [vmem:[#allocation5 + $0x1a8] ss:$16 sps:$4 sm:$0xff]   ;;  %v2823_v58 = vld [vmem:[#allocation5 + $0x1c4] ss:$16 sps:$4 sm:$0xff]   ;;  %v2825_v59 = vld [vmem:[#allocation5 + $0x1cc] ss:$16 sps:$4 sm:$0xff]  }
  0x4b   :  { %1683 = vmatprep.mubr.bf16.mxu0 %v2362_v48  ;;  %1847 = vmatprep.mubr.bf16.mxu1 %v2362_v48  ;;  %v2827_v60 = vld [vmem:[#allocation5 + $0x1c0] ss:$16 sps:$4 sm:$0xff]   ;;  %v2828_v61 = vld [vmem:[#allocation5 + $0x1c8] ss:$16 sps:$4 sm:$0xff]   ;;  %v2829_v62 = vld [vmem:[#allocation5 + $0x1e4] ss:$16 sps:$4 sm:$0xff]  }
  0x4c   :  { %v2831_v63 = vld [vmem:[#allocation5 + $0x1ec] ss:$16 sps:$4 sm:$0xff]   ;;  %v2833_v0 = vld [vmem:[#allocation5 + $0x1e0] ss:$16 sps:$4 sm:$0xff]   ;;  %v2834_v1 = vld [vmem:[#allocation5 + $0x1e8] ss:$16 sps:$4 sm:$0xff]  }
  0x4d   :  { %1662 = vmatpush1.bf16.msra.mxu0 %v2773_v22  ;;  %1826 = vmatpush1.bf16.msra.mxu1 %v2774_v23  ;;  %v2839_v2 = vld [vmem:[#allocation5 + $0x204] ss:$16 sps:$4 sm:$0xff]   ;;  %v2842_v3 = vld [vmem:[#allocation5 + $0x20c] ss:$16 sps:$4 sm:$0xff]   ;;  %v2837_v5 = vld [vmem:[#allocation5 + $0x200] ss:$16 sps:$4 sm:$0xff]  }
  0x4e   :  { %1663 = vmatprep.subr.bf16.mxu0 %v2775_v24  ;;  %1827 = vmatprep.subr.bf16.mxu1 %v2777_v25  ;;  %v2840_v6 = vld [vmem:[#allocation5 + $0x208] ss:$16 sps:$4 sm:$0xff]   ;;  %v2845_v7 = vld [vmem:[#allocation5 + $0x224] ss:$16 sps:$4 sm:$0xff]   ;;  %v2848_v8 = vld [vmem:[#allocation5 + $0x22c] ss:$16 sps:$4 sm:$0xff]  }
  0x4f   :  { %v2843_v9 = vld [vmem:[#allocation5 + $0x220] ss:$16 sps:$4 sm:$0xff]   ;;  %v2846_v10 = vld [vmem:[#allocation5 + $0x228] ss:$16 sps:$4 sm:$0xff]   ;;  %v2851_v11 = vld [vmem:[#allocation5 + $0x244] ss:$16 sps:$4 sm:$0xff]  }
  0x50   :  { %v2854_v12 = vld [vmem:[#allocation5 + $0x24c] ss:$16 sps:$4 sm:$0xff]   ;;  %v2849_v13 = vld [vmem:[#allocation5 + $0x240] ss:$16 sps:$4 sm:$0xff]   ;;  %v2852_v14 = vld [vmem:[#allocation5 + $0x248] ss:$16 sps:$4 sm:$0xff]  }
  0x51   :  { %1664 = vmatpush1.bf16.msra.mxu0 %v2779_v26  ;;  %1828 = vmatpush1.bf16.msra.mxu1 %v2780_v27  ;;  %v2857_v15 = vld [vmem:[#allocation5 + $0x264] ss:$16 sps:$4 sm:$0xff]   ;;  %v2860_v16 = vld [vmem:[#allocation5 + $0x26c] ss:$16 sps:$4 sm:$0xff]   ;;  %v2855_v17 = vld [vmem:[#allocation5 + $0x260] ss:$16 sps:$4 sm:$0xff]  }
  0x52   :  { %1665 = vmatprep.subr.bf16.mxu0 %v2781_v28  ;;  %1829 = vmatprep.subr.bf16.mxu1 %v2783_v29  ;;  %v2858_v18 = vld [vmem:[#allocation5 + $0x268] ss:$16 sps:$4 sm:$0xff]   ;;  %v2863_v19 = vld [vmem:[#allocation5 + $0x284] ss:$16 sps:$4 sm:$0xff]   ;;  %v2866_v20 = vld [vmem:[#allocation5 + $0x28c] ss:$16 sps:$4 sm:$0xff]  }
  0x53   :  { %v2861_v21 = vld [vmem:[#allocation5 + $0x280] ss:$16 sps:$4 sm:$0xff]   ;;  %v2864_v22 = vld [vmem:[#allocation5 + $0x288] ss:$16 sps:$4 sm:$0xff]   ;;  %v2869_v23 = vld [vmem:[#allocation5 + $0x2a4] ss:$16 sps:$4 sm:$0xff]  }
  0x54   :  { %v2872_v24 = vld [vmem:[#allocation5 + $0x2ac] ss:$16 sps:$4 sm:$0xff]   ;;  %v2867_v25 = vld [vmem:[#allocation5 + $0x2a0] ss:$16 sps:$4 sm:$0xff]   ;;  %v2870_v26 = vld [vmem:[#allocation5 + $0x2a8] ss:$16 sps:$4 sm:$0xff]  }
  0x55   :  { %1666 = vmatpush1.bf16.msra.mxu0 %v2785_v30  ;;  %1830 = vmatpush1.bf16.msra.mxu1 %v2786_v31  ;;  %v2875_v27 = vld [vmem:[#allocation5 + $0x2c4] ss:$16 sps:$4 sm:$0xff]   ;;  %v2878_v28 = vld [vmem:[#allocation5 + $0x2cc] ss:$16 sps:$4 sm:$0xff]   ;;  %v2873_v31 = vld [vmem:[#allocation5 + $0x2c0] ss:$16 sps:$4 sm:$0xff]  }
  0x56   :  { %1667 = vmatprep.subr.bf16.mxu0 %v2787_v32  ;;  %1831 = vmatprep.subr.bf16.mxu1 %v2789_v33  ;;  %v3335_v29 = vld [vmem:[#allocation2 + $0x8] sm:$0xff]  ;;  %v2881_v33 = vld [vmem:[#allocation5 + $0x2e4] ss:$16 sps:$4 sm:$0xff]   ;;  %s2351_s9 = sshll.u32 %s3268_s8, 4  ;;  %s2352_s9 = int_to_ptr.vmem [resolvable:$true] %s2351_s9 }
  0x57   :  { %v2364_v30 = vcombine.high %v3335_v29, %v3335_v29  ;;  %v2876_v32 = vld [vmem:[#allocation5 + $0x2c8] ss:$16 sps:$4 sm:$0xff]   ;;  %v2902_v46 = vld [vmem:[#allocation5 + $0x34c] ss:$16 sps:$4 sm:$0xff]   ;;  %p3238_p11 = scmp.lt.s32.totalorder %s2352_s9, %s2352_s9 }
  0x58   :  { %v2900_v48 = vld [vmem:[#allocation5 + $0x348] ss:$16 sps:$4 sm:$0xff]  }
  0x59   :  { %1668 = vmatpush1.bf16.msra.mxu0 %v2791_v34  ;;  %1832 = vmatpush1.bf16.msra.mxu1 %v2792_v35  ;;  %v2884_v34 = vld [vmem:[#allocation5 + $0x2ec] ss:$16 sps:$4 sm:$0xff]   ;;  %v2879_v35 = vld [vmem:[#allocation5 + $0x2e0] ss:$16 sps:$4 sm:$0xff]  }
  0x5a   :  { %1669 = vmatprep.subr.bf16.mxu0 %v2793_v36  ;;  %1833 = vmatprep.subr.bf16.mxu1 %v2795_v37  ;;  %v2882_v36 = vld [vmem:[#allocation5 + $0x2e8] ss:$16 sps:$4 sm:$0xff]   ;;  %v2887_v37 = vld [vmem:[#allocation5 + $0x304] ss:$16 sps:$4 sm:$0xff]  }
  0x5d   :  { %1670 = vmatpush1.bf16.msra.mxu0 %v2797_v38  ;;  %1834 = vmatpush1.bf16.msra.mxu1 %v2798_v39  ;;  %v2890_v38 = vld [vmem:[#allocation5 + $0x30c] ss:$16 sps:$4 sm:$0xff]   ;;  %v2885_v39 = vld [vmem:[#allocation5 + $0x300] ss:$16 sps:$4 sm:$0xff]  }
  0x5e   :  { %1671 = vmatprep.subr.bf16.mxu0 %v2799_v40  ;;  %1835 = vmatprep.subr.bf16.mxu1 %v2801_v41  ;;  %v2888_v40 = vld [vmem:[#allocation5 + $0x308] ss:$16 sps:$4 sm:$0xff]   ;;  %v2893_v41 = vld [vmem:[#allocation5 + $0x324] ss:$16 sps:$4 sm:$0xff]  }
  0x61   :  { %1672 = vmatpush1.bf16.msra.mxu0 %v2803_v42  ;;  %1836 = vmatpush1.bf16.msra.mxu1 %v2804_v43  ;;  %v2896_v42 = vld [vmem:[#allocation5 + $0x32c] ss:$16 sps:$4 sm:$0xff]   ;;  %v2891_v43 = vld [vmem:[#allocation5 + $0x320] ss:$16 sps:$4 sm:$0xff]  }
  0x62   :  { %1673 = vmatprep.subr.bf16.mxu0 %v2805_v44  ;;  %1837 = vmatprep.subr.bf16.mxu1 %v2807_v45  ;;  %v2894_v44 = vld [vmem:[#allocation5 + $0x328] ss:$16 sps:$4 sm:$0xff]   ;;  %v2899_v45 = vld [vmem:[#allocation5 + $0x344] ss:$16 sps:$4 sm:$0xff]  }
  0x65   :  { %1674 = vmatpush1.bf16.msra.mxu0 %v2809_v47  ;;  %1838 = vmatpush1.bf16.msra.mxu1 %v2810_v49  ;;  %v2897_v47 = vld [vmem:[#allocation5 + $0x340] ss:$16 sps:$4 sm:$0xff]   ;;  %v2905_v49 = vld [vmem:[#allocation5 + $0x364] ss:$16 sps:$4 sm:$0xff]  }
  0x66   :  { %1675 = vmatprep.subr.bf16.mxu0 %v2811_v50  ;;  %1839 = vmatprep.subr.bf16.mxu1 %v2813_v51  ;;  %v2908_v50 = vld [vmem:[#allocation5 + $0x36c] ss:$16 sps:$4 sm:$0xff]   ;;  %v2903_v51 = vld [vmem:[#allocation5 + $0x360] ss:$16 sps:$4 sm:$0xff]  }
  0x69   :  { %1676 = vmatpush1.bf16.msra.mxu0 %v2815_v52  ;;  %1840 = vmatpush1.bf16.msra.mxu1 %v2816_v53  ;;  %v2906_v52 = vld [vmem:[#allocation5 + $0x368] ss:$16 sps:$4 sm:$0xff]   ;;  %v2911_v53 = vld [vmem:[#allocation5 + $0x384] ss:$16 sps:$4 sm:$0xff]  }
  0x6a   :  { %1677 = vmatprep.subr.bf16.mxu0 %v2817_v54  ;;  %1841 = vmatprep.subr.bf16.mxu1 %v2819_v55  ;;  %v2914_v54 = vld [vmem:[#allocation5 + $0x38c] ss:$16 sps:$4 sm:$0xff]   ;;  %v2909_v55 = vld [vmem:[#allocation5 + $0x380] ss:$16 sps:$4 sm:$0xff]  }
  0x6d   :  { %1678 = vmatpush1.bf16.msra.mxu0 %v2821_v56  ;;  %1842 = vmatpush1.bf16.msra.mxu1 %v2822_v57  ;;  %v2912_v56 = vld [vmem:[#allocation5 + $0x388] ss:$16 sps:$4 sm:$0xff]   ;;  %v2917_v57 = vld [vmem:[#allocation5 + $0x3a4] ss:$16 sps:$4 sm:$0xff]  }
  0x6e   :  { %1679 = vmatprep.subr.bf16.mxu0 %v2823_v58  ;;  %1843 = vmatprep.subr.bf16.mxu1 %v2825_v59  ;;  %v2920_v58 = vld [vmem:[#allocation5 + $0x3ac] ss:$16 sps:$4 sm:$0xff]   ;;  %v2915_v59 = vld [vmem:[#allocation5 + $0x3a0] ss:$16 sps:$4 sm:$0xff]  }
  0x71   :  { %1680 = vmatpush1.bf16.msra.mxu0 %v2827_v60  ;;  %1844 = vmatpush1.bf16.msra.mxu1 %v2828_v61  ;;  %v2918_v60 = vld [vmem:[#allocation5 + $0x3a8] ss:$16 sps:$4 sm:$0xff]   ;;  %v2923_v61 = vld [vmem:[#allocation5 + $0x3c4] ss:$16 sps:$4 sm:$0xff]  }
  0x72   :  { %1681 = vmatprep.subr.bf16.mxu0 %v2829_v62  ;;  %1845 = vmatprep.subr.bf16.mxu1 %v2831_v63  ;;  %v2926_v62 = vld [vmem:[#allocation5 + $0x3cc] ss:$16 sps:$4 sm:$0xff]   ;;  %v2921_v63 = vld [vmem:[#allocation5 + $0x3c0] ss:$16 sps:$4 sm:$0xff]  }
  0x75   :  { %1682 = vmatpush1.bf16.msra.mxu0 %v2833_v0  ;;  %1846 = vmatpush1.bf16.msra.mxu1 %v2834_v1  ;;  %v2924_v0 = vld [vmem:[#allocation5 + $0x3c8] ss:$16 sps:$4 sm:$0xff]   ;;  %v2929_v1 = vld [vmem:[#allocation5 + $0x3e4] ss:$16 sps:$4 sm:$0xff]  }
  0x76   :  { %1692 = vmatprep.subr.bf16.mxu0 %v2839_v2  ;;  %1856 = vmatprep.subr.bf16.mxu1 %v2842_v3  ;;  %v2932_v2 = vld [vmem:[#allocation5 + $0x3ec] ss:$16 sps:$4 sm:$0xff]   ;;  %v2927_v3 = vld [vmem:[#allocation5 + $0x3e0] ss:$16 sps:$4 sm:$0xff]  }
  0x78   :  { %1684 = vmatmul.mubr.bf16.vlgmr.msra.gmra.mrb[0].mxu0 %v2361_v4  ;;  %1848 = vmatmul.mubr.bf16.vlgmr.msra.gmra.mrb[0].mxu1 %v2361_v4  ;;  %v2930_v4 = vld [vmem:[#allocation5 + $0x3e8] ss:$16 sps:$4 sm:$0xff]  }
  0x79   :  { %1693 = vmatpush1.bf16.msra.mxu0 %v2837_v5  ;;  %1857 = vmatpush1.bf16.msra.mxu1 %v2840_v6  ;;  %v2937_v5 = vld [vmem:[#allocation5 + $0x404] ss:$16 sps:$4 sm:$0xff]   ;;  %v2940_v6 = vld [vmem:[#allocation5 + $0x40c] ss:$16 sps:$4 sm:$0xff]  }
  0x7a   :  { %1694 = vmatprep.subr.bf16.mxu0 %v2845_v7  ;;  %1858 = vmatprep.subr.bf16.mxu1 %v2848_v8  ;;  %v2363_v7 = vcombine.low %v3335_v29, %v3335_v29  ;;  %v2935_v8 = vld [vmem:[#allocation5 + $0x400] ss:$16 sps:$4 sm:$0xff]   ;;  %v2970_v29 = vld [vmem:[#allocation5 + $0x4ac] ss:$16 sps:$4 sm:$0xff]  }
  0x7b   :  { %1724 = vmatprep.mubr.bf16.mxu0 %v2364_v30  ;;  %1888 = vmatprep.mubr.bf16.mxu1 %v2364_v30  ;;  %v2965_v30 = vld [vmem:[#allocation5 + $0x4a0] ss:$16 sps:$4 sm:$0xff]  }
  0x7d   :  { %1695 = vmatpush1.bf16.msra.mxu0 %v2843_v9  ;;  %1859 = vmatpush1.bf16.msra.mxu1 %v2846_v10  ;;  %v2938_v9 = vld [vmem:[#allocation5 + $0x408] ss:$16 sps:$4 sm:$0xff]   ;;  %v2943_v10 = vld [vmem:[#allocation5 + $0x424] ss:$16 sps:$4 sm:$0xff]  }
  0x7e   :  { %1696 = vmatprep.subr.bf16.mxu0 %v2851_v11  ;;  %1860 = vmatprep.subr.bf16.mxu1 %v2854_v12  ;;  %v3341_v11 = vld [vmem:[#allocation2 + $0x10] sm:$0xff]  ;;  %v2946_v12 = vld [vmem:[#allocation5 + $0x42c] ss:$16 sps:$4 sm:$0xff]  }
  0x81   :  { %1697 = vmatpush1.bf16.msra.mxu0 %v2849_v13  ;;  %1861 = vmatpush1.bf16.msra.mxu1 %v2852_v14  ;;  %v2366_v13 = vcombine.high %v3341_v11, %v3341_v11  ;;  %v2941_v14 = vld [vmem:[#allocation5 + $0x420] ss:$16 sps:$4 sm:$0xff]  }
  0x82   :  { %1698 = vmatprep.subr.bf16.mxu0 %v2857_v15  ;;  %1862 = vmatprep.subr.bf16.mxu1 %v2860_v16  ;;  %v2944_v15 = vld [vmem:[#allocation5 + $0x428] ss:$16 sps:$4 sm:$0xff]   ;;  %v2949_v16 = vld [vmem:[#allocation5 + $0x444] ss:$16 sps:$4 sm:$0xff]  }
  0x85   :  { %1699 = vmatpush1.bf16.msra.mxu0 %v2855_v17  ;;  %1863 = vmatpush1.bf16.msra.mxu1 %v2858_v18  ;;  %v2952_v17 = vld [vmem:[#allocation5 + $0x44c] ss:$16 sps:$4 sm:$0xff]   ;;  %v2947_v18 = vld [vmem:[#allocation5 + $0x440] ss:$16 sps:$4 sm:$0xff]  }
  0x86   :  { %1700 = vmatprep.subr.bf16.mxu0 %v2863_v19  ;;  %1864 = vmatprep.subr.bf16.mxu1 %v2866_v20  ;;  %v2950_v19 = vld [vmem:[#allocation5 + $0x448] ss:$16 sps:$4 sm:$0xff]   ;;  %v2955_v20 = vld [vmem:[#allocation5 + $0x464] ss:$16 sps:$4 sm:$0xff]  }
  0x89   :  { %1701 = vmatpush1.bf16.msra.mxu0 %v2861_v21  ;;  %1865 = vmatpush1.bf16.msra.mxu1 %v2864_v22  ;;  %v2958_v21 = vld [vmem:[#allocation5 + $0x46c] ss:$16 sps:$4 sm:$0xff]   ;;  %v2953_v22 = vld [vmem:[#allocation5 + $0x460] ss:$16 sps:$4 sm:$0xff]  }
  0x8a   :  { %1702 = vmatprep.subr.bf16.mxu0 %v2869_v23  ;;  %1866 = vmatprep.subr.bf16.mxu1 %v2872_v24  ;;  %v2956_v23 = vld [vmem:[#allocation5 + $0x468] ss:$16 sps:$4 sm:$0xff]   ;;  %v2961_v24 = vld [vmem:[#allocation5 + $0x484] ss:$16 sps:$4 sm:$0xff]  }
  0x8d   :  { %1703 = vmatpush1.bf16.msra.mxu0 %v2867_v25  ;;  %1867 = vmatpush1.bf16.msra.mxu1 %v2870_v26  ;;  %v2964_v25 = vld [vmem:[#allocation5 + $0x48c] ss:$16 sps:$4 sm:$0xff]   ;;  %v2959_v26 = vld [vmem:[#allocation5 + $0x480] ss:$16 sps:$4 sm:$0xff]  }
  0x8e   :  { %1704 = vmatprep.subr.bf16.mxu0 %v2875_v27  ;;  %1868 = vmatprep.subr.bf16.mxu1 %v2878_v28  ;;  %v2962_v27 = vld [vmem:[#allocation5 + $0x488] ss:$16 sps:$4 sm:$0xff]   ;;  %v2967_v28 = vld [vmem:[#allocation5 + $0x4a4] ss:$16 sps:$4 sm:$0xff]  }
  0x91   :  { %1705 = vmatpush1.bf16.msra.mxu0 %v2873_v31  ;;  %1869 = vmatpush1.bf16.msra.mxu1 %v2876_v32  ;;  %v2968_v31 = vld [vmem:[#allocation5 + $0x4a8] ss:$16 sps:$4 sm:$0xff]   ;;  %v2973_v32 = vld [vmem:[#allocation5 + $0x4c4] ss:$16 sps:$4 sm:$0xff]  }
  0x92   :  { %1706 = vmatprep.subr.bf16.mxu0 %v2881_v33  ;;  %1870 = vmatprep.subr.bf16.mxu1 %v2884_v34  ;;  %v2976_v33 = vld [vmem:[#allocation5 + $0x4cc] ss:$16 sps:$4 sm:$0xff]   ;;  %v2971_v34 = vld [vmem:[#allocation5 + $0x4c0] ss:$16 sps:$4 sm:$0xff]  }
  0x95   :  { %1707 = vmatpush1.bf16.msra.mxu0 %v2879_v35  ;;  %1871 = vmatpush1.bf16.msra.mxu1 %v2882_v36  ;;  %v2974_v35 = vld [vmem:[#allocation5 + $0x4c8] ss:$16 sps:$4 sm:$0xff]   ;;  %v2979_v36 = vld [vmem:[#allocation5 + $0x4e4] ss:$16 sps:$4 sm:$0xff]  }
  0x96   :  { %1708 = vmatprep.subr.bf16.mxu0 %v2887_v37  ;;  %1872 = vmatprep.subr.bf16.mxu1 %v2890_v38  ;;  %v2982_v37 = vld [vmem:[#allocation5 + $0x4ec] ss:$16 sps:$4 sm:$0xff]   ;;  %v2977_v38 = vld [vmem:[#allocation5 + $0x4e0] ss:$16 sps:$4 sm:$0xff]  }
  0x99   :  { %1709 = vmatpush1.bf16.msra.mxu0 %v2885_v39  ;;  %1873 = vmatpush1.bf16.msra.mxu1 %v2888_v40  ;;  %v2980_v39 = vld [vmem:[#allocation5 + $0x4e8] ss:$16 sps:$4 sm:$0xff]   ;;  %v2985_v40 = vld [vmem:[#allocation5 + $0x504] ss:$16 sps:$4 sm:$0xff]  }
  0x9a   :  { %1710 = vmatprep.subr.bf16.mxu0 %v2893_v41  ;;  %1874 = vmatprep.subr.bf16.mxu1 %v2896_v42  ;;  %v2988_v41 = vld [vmem:[#allocation5 + $0x50c] ss:$16 sps:$4 sm:$0xff]   ;;  %v2983_v42 = vld [vmem:[#allocation5 + $0x500] ss:$16 sps:$4 sm:$0xff]  }
  0x9d   :  { %1711 = vmatpush1.bf16.msra.mxu0 %v2891_v43  ;;  %1875 = vmatpush1.bf16.msra.mxu1 %v2894_v44  ;;  %v2986_v43 = vld [vmem:[#allocation5 + $0x508] ss:$16 sps:$4 sm:$0xff]   ;;  %v2991_v44 = vld [vmem:[#allocation5 + $0x524] ss:$16 sps:$4 sm:$0xff]  }
  0x9e   :  { %1712 = vmatprep.subr.bf16.mxu0 %v2899_v45  ;;  %1876 = vmatprep.subr.bf16.mxu1 %v2902_v46  ;;  %v2994_v45 = vld [vmem:[#allocation5 + $0x52c] ss:$16 sps:$4 sm:$0xff]   ;;  %v2989_v46 = vld [vmem:[#allocation5 + $0x520] ss:$16 sps:$4 sm:$0xff]  }
  0xa1   :  { %1713 = vmatpush1.bf16.msra.mxu0 %v2897_v47  ;;  %1877 = vmatpush1.bf16.msra.mxu1 %v2900_v48  ;;  %v2992_v47 = vld [vmem:[#allocation5 + $0x528] ss:$16 sps:$4 sm:$0xff]   ;;  %v2997_v48 = vld [vmem:[#allocation5 + $0x544] ss:$16 sps:$4 sm:$0xff]  }
  0xa2   :  { %1714 = vmatprep.subr.bf16.mxu0 %v2905_v49  ;;  %1878 = vmatprep.subr.bf16.mxu1 %v2908_v50  ;;  %v3000_v49 = vld [vmem:[#allocation5 + $0x54c] ss:$16 sps:$4 sm:$0xff]   ;;  %v2995_v50 = vld [vmem:[#allocation5 + $0x540] ss:$16 sps:$4 sm:$0xff]  }
  0xa5   :  { %1715 = vmatpush1.bf16.msra.mxu0 %v2903_v51  ;;  %1879 = vmatpush1.bf16.msra.mxu1 %v2906_v52  ;;  %v2998_v51 = vld [vmem:[#allocation5 + $0x548] ss:$16 sps:$4 sm:$0xff]   ;;  %v3003_v52 = vld [vmem:[#allocation5 + $0x564] ss:$16 sps:$4 sm:$0xff]  }
  0xa6   :  { %1716 = vmatprep.subr.bf16.mxu0 %v2911_v53  ;;  %1880 = vmatprep.subr.bf16.mxu1 %v2914_v54  ;;  %v3006_v53 = vld [vmem:[#allocation5 + $0x56c] ss:$16 sps:$4 sm:$0xff]   ;;  %v3001_v54 = vld [vmem:[#allocation5 + $0x560] ss:$16 sps:$4 sm:$0xff]  }
  0xa9   :  { %1717 = vmatpush1.bf16.msra.mxu0 %v2909_v55  ;;  %1881 = vmatpush1.bf16.msra.mxu1 %v2912_v56  ;;  %v3004_v55 = vld [vmem:[#allocation5 + $0x568] ss:$16 sps:$4 sm:$0xff]   ;;  %v3009_v56 = vld [vmem:[#allocation5 + $0x584] ss:$16 sps:$4 sm:$0xff]  }
  0xaa   :  { %1718 = vmatprep.subr.bf16.mxu0 %v2917_v57  ;;  %1882 = vmatprep.subr.bf16.mxu1 %v2920_v58  ;;  %v3012_v57 = vld [vmem:[#allocation5 + $0x58c] ss:$16 sps:$4 sm:$0xff]   ;;  %v3007_v58 = vld [vmem:[#allocation5 + $0x580] ss:$16 sps:$4 sm:$0xff]  }
  0xad   :  { %1719 = vmatpush1.bf16.msra.mxu0 %v2915_v59  ;;  %1883 = vmatpush1.bf16.msra.mxu1 %v2918_v60  ;;  %v3010_v59 = vld [vmem:[#allocation5 + $0x588] ss:$16 sps:$4 sm:$0xff]   ;;  %v3015_v60 = vld [vmem:[#allocation5 + $0x5a4] ss:$16 sps:$4 sm:$0xff]  }
  0xae   :  { %1720 = vmatprep.subr.bf16.mxu0 %v2923_v61  ;;  %1884 = vmatprep.subr.bf16.mxu1 %v2926_v62  ;;  %v3018_v61 = vld [vmem:[#allocation5 + $0x5ac] ss:$16 sps:$4 sm:$0xff]   ;;  %v3013_v62 = vld [vmem:[#allocation5 + $0x5a0] ss:$16 sps:$4 sm:$0xff]  }
  0xb1   :  { %1721 = vmatpush1.bf16.msra.mxu0 %v2921_v63  ;;  %1885 = vmatpush1.bf16.msra.mxu1 %v2924_v0  ;;  %v3016_v63 = vld [vmem:[#allocation5 + $0x5a8] ss:$16 sps:$4 sm:$0xff]   ;;  %v3021_v0 = vld [vmem:[#allocation5 + $0x5c4] ss:$16 sps:$4 sm:$0xff]  }
  0xb2   :  { %1722 = vmatprep.subr.bf16.mxu0 %v2929_v1  ;;  %1886 = vmatprep.subr.bf16.mxu1 %v2932_v2  ;;  %v3024_v1 = vld [vmem:[#allocation5 + $0x5cc] ss:$16 sps:$4 sm:$0xff]   ;;  %v3019_v2 = vld [vmem:[#allocation5 + $0x5c0] ss:$16 sps:$4 sm:$0xff]  }
  0xb5   :  { %1723 = vmatpush1.bf16.msra.mxu0 %v2927_v3  ;;  %1887 = vmatpush1.bf16.msra.mxu1 %v2930_v4  ;;  %v3022_v3 = vld [vmem:[#allocation5 + $0x5c8] ss:$16 sps:$4 sm:$0xff]   ;;  %v3027_v4 = vld [vmem:[#allocation5 + $0x5e4] ss:$16 sps:$4 sm:$0xff]  }
  0xb6   :  { %1733 = vmatprep.subr.bf16.mxu0 %v2937_v5  ;;  %1897 = vmatprep.subr.bf16.mxu1 %v2940_v6  ;;  %v3030_v5 = vld [vmem:[#allocation5 + $0x5ec] ss:$16 sps:$4 sm:$0xff]   ;;  %v3025_v6 = vld [vmem:[#allocation5 + $0x5e0] ss:$16 sps:$4 sm:$0xff]  }
  0xb8   :  { %1725 = vmatmul.mubr.bf16.vlgmr.msra.gmra.mrb[0].mxu0 %v2363_v7  ;;  %1889 = vmatmul.mubr.bf16.vlgmr.msra.gmra.mrb[0].mxu1 %v2363_v7  ;;  %v3028_v7 = vld [vmem:[#allocation5 + $0x5e8] ss:$16 sps:$4 sm:$0xff]  }
  0xb9   :  { %1734 = vmatpush1.bf16.msra.mxu0 %v2935_v8  ;;  %1898 = vmatpush1.bf16.msra.mxu1 %v2938_v9  ;;  %v3035_v8 = vld [vmem:[#allocation5 + $0x604] ss:$16 sps:$4 sm:$0xff]   ;;  %v3038_v9 = vld [vmem:[#allocation5 + $0x60c] ss:$16 sps:$4 sm:$0xff]  }
  0xba   :  { %1735 = vmatprep.subr.bf16.mxu0 %v2943_v10  ;;  %1899 = vmatprep.subr.bf16.mxu1 %v2946_v12  ;;  %v3033_v10 = vld [vmem:[#allocation5 + $0x600] ss:$16 sps:$4 sm:$0xff]   ;;  %v3036_v12 = vld [vmem:[#allocation5 + $0x608] ss:$16 sps:$4 sm:$0xff]  }
  0xbb   :  { %1765 = vmatprep.mubr.bf16.mxu0 %v2366_v13  ;;  %1929 = vmatprep.mubr.bf16.mxu1 %v2366_v13  ;;  %v2365_v13 = vcombine.low %v3341_v11, %v3341_v11  ;;  %v3045_v11 = vld [vmem:[#allocation5 + $0x640] ss:$16 sps:$4 sm:$0xff]  }
  0xbd   :  { %1736 = vmatpush1.bf16.msra.mxu0 %v2941_v14  ;;  %1900 = vmatpush1.bf16.msra.mxu1 %v2944_v15  ;;  %v3347_v14 = vld [vmem:[#allocation2 + $0x18] sm:$0xff]  ;;  %v3041_v15 = vld [vmem:[#allocation5 + $0x624] ss:$16 sps:$4 sm:$0xff]  }
  0xbe   :  { %1737 = vmatprep.subr.bf16.mxu0 %v2949_v16  ;;  %1901 = vmatprep.subr.bf16.mxu1 %v2952_v17  ;;  %v3044_v16 = vld [vmem:[#allocation5 + $0x62c] ss:$16 sps:$4 sm:$0xff]   ;;  %v3039_v17 = vld [vmem:[#allocation5 + $0x620] ss:$16 sps:$4 sm:$0xff]  }
  0xc1   :  { %1738 = vmatpush1.bf16.msra.mxu0 %v2947_v18  ;;  %1902 = vmatpush1.bf16.msra.mxu1 %v2950_v19  ;;  %v3042_v18 = vld [vmem:[#allocation5 + $0x628] ss:$16 sps:$4 sm:$0xff]   ;;  %v2368_v19 = vcombine.high %v3347_v14, %v3347_v14 }
  0xc2   :  { %1739 = vmatprep.subr.bf16.mxu0 %v2955_v20  ;;  %1903 = vmatprep.subr.bf16.mxu1 %v2958_v21  ;;  %v3047_v20 = vld [vmem:[#allocation5 + $0x644] ss:$16 sps:$4 sm:$0xff]   ;;  %v3050_v21 = vld [vmem:[#allocation5 + $0x64c] ss:$16 sps:$4 sm:$0xff]  }
  0xc5   :  { %1740 = vmatpush1.bf16.msra.mxu0 %v2953_v22  ;;  %1904 = vmatpush1.bf16.msra.mxu1 %v2956_v23  ;;  %v3048_v22 = vld [vmem:[#allocation5 + $0x648] ss:$16 sps:$4 sm:$0xff]   ;;  %v3053_v23 = vld [vmem:[#allocation5 + $0x664] ss:$16 sps:$4 sm:$0xff]  }
  0xc6   :  { %1741 = vmatprep.subr.bf16.mxu0 %v2961_v24  ;;  %1905 = vmatprep.subr.bf16.mxu1 %v2964_v25  ;;  %v3056_v24 = vld [vmem:[#allocation5 + $0x66c] ss:$16 sps:$4 sm:$0xff]   ;;  %v3051_v25 = vld [vmem:[#allocation5 + $0x660] ss:$16 sps:$4 sm:$0xff]  }
  0xc9   :  { %1742 = vmatpush1.bf16.msra.mxu0 %v2959_v26  ;;  %1906 = vmatpush1.bf16.msra.mxu1 %v2962_v27  ;;  %v3054_v26 = vld [vmem:[#allocation5 + $0x668] ss:$16 sps:$4 sm:$0xff]   ;;  %v3059_v27 = vld [vmem:[#allocation5 + $0x684] ss:$16 sps:$4 sm:$0xff]  }
  0xca   :  { %1743 = vmatprep.subr.bf16.mxu0 %v2967_v28  ;;  %1907 = vmatprep.subr.bf16.mxu1 %v2970_v29  ;;  %v3062_v28 = vld [vmem:[#allocation5 + $0x68c] ss:$16 sps:$4 sm:$0xff]   ;;  %v3057_v29 = vld [vmem:[#allocation5 + $0x680] ss:$16 sps:$4 sm:$0xff]  }
  0xcd   :  { %1744 = vmatpush1.bf16.msra.mxu0 %v2965_v30  ;;  %1908 = vmatpush1.bf16.msra.mxu1 %v2968_v31  ;;  %v3060_v30 = vld [vmem:[#allocation5 + $0x688] ss:$16 sps:$4 sm:$0xff]   ;;  %v3065_v31 = vld [vmem:[#allocation5 + $0x6a4] ss:$16 sps:$4 sm:$0xff]  }
  0xce   :  { %1745 = vmatprep.subr.bf16.mxu0 %v2973_v32  ;;  %1909 = vmatprep.subr.bf16.mxu1 %v2976_v33  ;;  %v3068_v32 = vld [vmem:[#allocation5 + $0x6ac] ss:$16 sps:$4 sm:$0xff]   ;;  %v3063_v33 = vld [vmem:[#allocation5 + $0x6a0] ss:$16 sps:$4 sm:$0xff]  }
  0xd1   :  { %1746 = vmatpush1.bf16.msra.mxu0 %v2971_v34  ;;  %1910 = vmatpush1.bf16.msra.mxu1 %v2974_v35  ;;  %v3066_v34 = vld [vmem:[#allocation5 + $0x6a8] ss:$16 sps:$4 sm:$0xff]   ;;  %v3071_v35 = vld [vmem:[#allocation5 + $0x6c4] ss:$16 sps:$4 sm:$0xff]  }
  0xd2   :  { %1747 = vmatprep.subr.bf16.mxu0 %v2979_v36  ;;  %1911 = vmatprep.subr.bf16.mxu1 %v2982_v37  ;;  %v3074_v36 = vld [vmem:[#allocation5 + $0x6cc] ss:$16 sps:$4 sm:$0xff]   ;;  %v3069_v37 = vld [vmem:[#allocation5 + $0x6c0] ss:$16 sps:$4 sm:$0xff]  }
  0xd5   :  { %1748 = vmatpush1.bf16.msra.mxu0 %v2977_v38  ;;  %1912 = vmatpush1.bf16.msra.mxu1 %v2980_v39  ;;  %v3072_v38 = vld [vmem:[#allocation5 + $0x6c8] ss:$16 sps:$4 sm:$0xff]   ;;  %v3077_v39 = vld [vmem:[#allocation5 + $0x6e4] ss:$16 sps:$4 sm:$0xff]  }
  0xd6   :  { %1749 = vmatprep.subr.bf16.mxu0 %v2985_v40  ;;  %1913 = vmatprep.subr.bf16.mxu1 %v2988_v41  ;;  %v3080_v40 = vld [vmem:[#allocation5 + $0x6ec] ss:$16 sps:$4 sm:$0xff]   ;;  %v3075_v41 = vld [vmem:[#allocation5 + $0x6e0] ss:$16 sps:$4 sm:$0xff]  }
  0xd9   :  { %1750 = vmatpush1.bf16.msra.mxu0 %v2983_v42  ;;  %1914 = vmatpush1.bf16.msra.mxu1 %v2986_v43  ;;  %v3078_v42 = vld [vmem:[#allocation5 + $0x6e8] ss:$16 sps:$4 sm:$0xff]   ;;  %v3083_v43 = vld [vmem:[#allocation5 + $0x704] ss:$16 sps:$4 sm:$0xff]  }
  0xda   :  { %1751 = vmatprep.subr.bf16.mxu0 %v2991_v44  ;;  %1915 = vmatprep.subr.bf16.mxu1 %v2994_v45  ;;  %v3086_v44 = vld [vmem:[#allocation5 + $0x70c] ss:$16 sps:$4 sm:$0xff]   ;;  %v3081_v45 = vld [vmem:[#allocation5 + $0x700] ss:$16 sps:$4 sm:$0xff]  }
  0xdd   :  { %1752 = vmatpush1.bf16.msra.mxu0 %v2989_v46  ;;  %1916 = vmatpush1.bf16.msra.mxu1 %v2992_v47  ;;  %v3084_v46 = vld [vmem:[#allocation5 + $0x708] ss:$16 sps:$4 sm:$0xff]   ;;  %v3089_v47 = vld [vmem:[#allocation5 + $0x724] ss:$16 sps:$4 sm:$0xff]  }
  0xde   :  { %1753 = vmatprep.subr.bf16.mxu0 %v2997_v48  ;;  %1917 = vmatprep.subr.bf16.mxu1 %v3000_v49  ;;  %v3092_v48 = vld [vmem:[#allocation5 + $0x72c] ss:$16 sps:$4 sm:$0xff]   ;;  %v3087_v49 = vld [vmem:[#allocation5 + $0x720] ss:$16 sps:$4 sm:$0xff]  }
  0xe1   :  { %1754 = vmatpush1.bf16.msra.mxu0 %v2995_v50  ;;  %1918 = vmatpush1.bf16.msra.mxu1 %v2998_v51  ;;  %v3090_v50 = vld [vmem:[#allocation5 + $0x728] ss:$16 sps:$4 sm:$0xff]   ;;  %v3095_v51 = vld [vmem:[#allocation5 + $0x744] ss:$16 sps:$4 sm:$0xff]  }
  0xe2   :  { %1755 = vmatprep.subr.bf16.mxu0 %v3003_v52  ;;  %1919 = vmatprep.subr.bf16.mxu1 %v3006_v53  ;;  %v3098_v52 = vld [vmem:[#allocation5 + $0x74c] ss:$16 sps:$4 sm:$0xff]   ;;  %v3093_v53 = vld [vmem:[#allocation5 + $0x740] ss:$16 sps:$4 sm:$0xff]  }
  0xe5   :  { %1756 = vmatpush1.bf16.msra.mxu0 %v3001_v54  ;;  %1920 = vmatpush1.bf16.msra.mxu1 %v3004_v55  ;;  %v3096_v54 = vld [vmem:[#allocation5 + $0x748] ss:$16 sps:$4 sm:$0xff]   ;;  %v3101_v55 = vld [vmem:[#allocation5 + $0x764] ss:$16 sps:$4 sm:$0xff]  }
  0xe6   :  { %1757 = vmatprep.subr.bf16.mxu0 %v3009_v56  ;;  %1921 = vmatprep.subr.bf16.mxu1 %v3012_v57  ;;  %v3104_v56 = vld [vmem:[#allocation5 + $0x76c] ss:$16 sps:$4 sm:$0xff]   ;;  %v3099_v57 = vld [vmem:[#allocation5 + $0x760] ss:$16 sps:$4 sm:$0xff]  }
  0xe9   :  { %1758 = vmatpush1.bf16.msra.mxu0 %v3007_v58  ;;  %1922 = vmatpush1.bf16.msra.mxu1 %v3010_v59  ;;  %v3102_v58 = vld [vmem:[#allocation5 + $0x768] ss:$16 sps:$4 sm:$0xff]   ;;  %v3107_v59 = vld [vmem:[#allocation5 + $0x784] ss:$16 sps:$4 sm:$0xff]  }
  0xea   :  { %1759 = vmatprep.subr.bf16.mxu0 %v3015_v60  ;;  %1923 = vmatprep.subr.bf16.mxu1 %v3018_v61  ;;  %v3110_v60 = vld [vmem:[#allocation5 + $0x78c] ss:$16 sps:$4 sm:$0xff]   ;;  %v3105_v61 = vld [vmem:[#allocation5 + $0x780] ss:$16 sps:$4 sm:$0xff]  }
  0xed   :  { %1760 = vmatpush1.bf16.msra.mxu0 %v3013_v62  ;;  %1924 = vmatpush1.bf16.msra.mxu1 %v3016_v63  ;;  %v3108_v62 = vld [vmem:[#allocation5 + $0x788] ss:$16 sps:$4 sm:$0xff]   ;;  %v3113_v63 = vld [vmem:[#allocation5 + $0x7a4] ss:$16 sps:$4 sm:$0xff]  }
  0xee   :  { %1761 = vmatprep.subr.bf16.mxu0 %v3021_v0  ;;  %1925 = vmatprep.subr.bf16.mxu1 %v3024_v1  ;;  %v3116_v0 = vld [vmem:[#allocation5 + $0x7ac] ss:$16 sps:$4 sm:$0xff]   ;;  %v3111_v1 = vld [vmem:[#allocation5 + $0x7a0] ss:$16 sps:$4 sm:$0xff]  }
  0xf1   :  { %1762 = vmatpush1.bf16.msra.mxu0 %v3019_v2  ;;  %1926 = vmatpush1.bf16.msra.mxu1 %v3022_v3  ;;  %v3114_v2 = vld [vmem:[#allocation5 + $0x7a8] ss:$16 sps:$4 sm:$0xff]   ;;  %v3119_v3 = vld [vmem:[#allocation5 + $0x7c4] ss:$16 sps:$4 sm:$0xff]  }
  0xf2   :  { %1763 = vmatprep.subr.bf16.mxu0 %v3027_v4  ;;  %1927 = vmatprep.subr.bf16.mxu1 %v3030_v5  ;;  %v3122_v4 = vld [vmem:[#allocation5 + $0x7cc] ss:$16 sps:$4 sm:$0xff]   ;;  %v3117_v5 = vld [vmem:[#allocation5 + $0x7c0] ss:$16 sps:$4 sm:$0xff]  }
  0xf5   :  { %1764 = vmatpush1.bf16.msra.mxu0 %v3025_v6  ;;  %1928 = vmatpush1.bf16.msra.mxu1 %v3028_v7  ;;  %v3120_v6 = vld [vmem:[#allocation5 + $0x7c8] ss:$16 sps:$4 sm:$0xff]   ;;  %v3125_v7 = vld [vmem:[#allocation5 + $0x7e4] ss:$16 sps:$4 sm:$0xff]  }
  0xf6   :  { %1774 = vmatprep.subr.bf16.mxu0 %v3035_v8  ;;  %1938 = vmatprep.subr.bf16.mxu1 %v3038_v9  ;;  %v3128_v8 = vld [vmem:[#allocation5 + $0x7ec] ss:$16 sps:$4 sm:$0xff]   ;;  %v3123_v9 = vld [vmem:[#allocation5 + $0x7e0] ss:$16 sps:$4 sm:$0xff]  }
  0xf8   :  { %1766 = vmatmul.mubr.bf16.vlgmr.msra.gmra.mrb[0].mxu0 %v2365_v13  ;;  %1930 = vmatmul.mubr.bf16.vlgmr.msra.gmra.mrb[0].mxu1 %v2365_v13  ;;  %v3132_v13 = vld [vmem:[#allocation7 + $0xc0] sm:$0xff]  }
  0xf9   :  { %1775 = vmatpush1.bf16.msra.mxu0 %v3033_v10  ;;  %1939 = vmatpush1.bf16.msra.mxu1 %v3036_v12  ;;  %v3126_v10 = vld [vmem:[#allocation5 + $0x7e8] ss:$16 sps:$4 sm:$0xff]   ;;  %v3131_v12 = vld [vmem:[#allocation7 + $0x40] sm:$0xff]  }
  0xfa   :  { %1776 = vmatprep.subr.bf16.mxu0 %v3041_v15  ;;  %1940 = vmatprep.subr.bf16.mxu1 %v3044_v16  ;;  %v2367_v15 = vcombine.low %v3347_v14, %v3347_v14  ;;  %v3133_v16 = vld [vmem:[#allocation7] sm:$0xff]   ;;  %v3141_v14 = vld [vmem:[#allocation7 + $0x10] sm:$0xff]  }
  0xfb   :  { %1806 = vmatprep.mubr.bf16.mxu0 %v2368_v19  ;;  %1970 = vmatprep.mubr.bf16.mxu1 %v2368_v19  ;;  %v3136_v19 = vld [vmem:[#allocation7 + $0xc8] sm:$0xff]  }
  0xfd   :  { %1777 = vmatpush1.bf16.msra.mxu0 %v3039_v17  ;;  %1941 = vmatpush1.bf16.msra.mxu1 %v3042_v18  ;;  %v3134_v17 = vld [vmem:[#allocation7 + $0x80] sm:$0xff]   ;;  %v3135_v18 = vld [vmem:[#allocation7 + $0x48] sm:$0xff]  }
  0xfe   :  { %1778 = vmatprep.subr.bf16.mxu0 %v3047_v20  ;;  %1942 = vmatprep.subr.bf16.mxu1 %v3050_v21  ;;  %v3137_v20 = vld [vmem:[#allocation7 + $0x8] sm:$0xff]  }
  0xff   :  { %v3138_v21 = vld [vmem:[#allocation7 + $0x88] sm:$0xff]  }
 0x101   :  { %1779 = vmatpush1.bf16.msra.mxu0 %v3045_v11  ;;  %1943 = vmatpush1.bf16.msra.mxu1 %v3048_v22  ;;  %v3139_v11 = vld [vmem:[#allocation7 + $0x50] sm:$0xff]  }
 0x102   :  { %1780 = vmatprep.subr.bf16.mxu0 %v3053_v23  ;;  %1944 = vmatprep.subr.bf16.mxu1 %v3056_v24  ;;  %v3140_v22 = vld [vmem:[#allocation7 + $0xd0] sm:$0xff]   ;;  %v3143_v24 = vld [vmem:[#allocation7 + $0x58] sm:$0xff]  }
 0x103   :  { %v3142_v23 = vld [vmem:[#allocation7 + $0x90] sm:$0xff]  }
 0x105   :  { %1781 = vmatpush1.bf16.msra.mxu0 %v3051_v25  ;;  %1945 = vmatpush1.bf16.msra.mxu1 %v3054_v26  ;;  %v3144_v25 = vld [vmem:[#allocation7 + $0xd8] sm:$0xff]  }
 0x106   :  { %1782 = vmatprep.subr.bf16.mxu0 %v3059_v27  ;;  %1946 = vmatprep.subr.bf16.mxu1 %v3062_v28  ;;  %v3145_v26 = vld [vmem:[#allocation7 + $0x18] sm:$0xff]   ;;  %v3147_v28 = vld [vmem:[#allocation7 + $0x60] sm:$0xff]  }
 0x107   :  { %v3146_v27 = vld [vmem:[#allocation7 + $0x98] sm:$0xff]  }
 0x109   :  { %1783 = vmatpush1.bf16.msra.mxu0 %v3057_v29  ;;  %1947 = vmatpush1.bf16.msra.mxu1 %v3060_v30  ;;  %v3148_v29 = vld [vmem:[#allocation7 + $0xe0] sm:$0xff]  }
 0x10a   :  { %1784 = vmatprep.subr.bf16.mxu0 %v3065_v31  ;;  %1948 = vmatprep.subr.bf16.mxu1 %v3068_v32  ;;  %v3149_v30 = vld [vmem:[#allocation7 + $0x20] sm:$0xff]   ;;  %v3151_v32 = vld [vmem:[#allocation7 + $0x68] sm:$0xff]  }
 0x10b   :  { %v3150_v31 = vld [vmem:[#allocation7 + $0xa0] sm:$0xff]  }
 0x10d   :  { %1785 = vmatpush1.bf16.msra.mxu0 %v3063_v33  ;;  %1949 = vmatpush1.bf16.msra.mxu1 %v3066_v34  ;;  %v3152_v33 = vld [vmem:[#allocation7 + $0xe8] sm:$0xff]  }
 0x10e   :  { %1786 = vmatprep.subr.bf16.mxu0 %v3071_v35  ;;  %1950 = vmatprep.subr.bf16.mxu1 %v3074_v36  ;;  %v3153_v34 = vld [vmem:[#allocation7 + $0x28] sm:$0xff]   ;;  %v3155_v36 = vld [vmem:[#allocation7 + $0x70] sm:$0xff]  }
 0x10f   :  { %v3154_v35 = vld [vmem:[#allocation7 + $0xa8] sm:$0xff]  }
 0x111   :  { %1787 = vmatpush1.bf16.msra.mxu0 %v3069_v37  ;;  %1951 = vmatpush1.bf16.msra.mxu1 %v3072_v38  ;;  %v3156_v37 = vld [vmem:[#allocation7 + $0xf0] sm:$0xff]  }
 0x112   :  { %1788 = vmatprep.subr.bf16.mxu0 %v3077_v39  ;;  %1952 = vmatprep.subr.bf16.mxu1 %v3080_v40  ;;  %v3157_v38 = vld [vmem:[#allocation7 + $0x30] sm:$0xff]   ;;  %v3159_v40 = vld [vmem:[#allocation7 + $0x78] sm:$0xff]  }
 0x113   :  { %v3158_v39 = vld [vmem:[#allocation7 + $0xb0] sm:$0xff]  }
 0x115   :  { %1789 = vmatpush1.bf16.msra.mxu0 %v3075_v41  ;;  %1953 = vmatpush1.bf16.msra.mxu1 %v3078_v42  ;;  %v3160_v41 = vld [vmem:[#allocation7 + $0xf8] sm:$0xff]  }
 0x116   :  { %1790 = vmatprep.subr.bf16.mxu0 %v3083_v43  ;;  %1954 = vmatprep.subr.bf16.mxu1 %v3086_v44  ;;  %v3161_v42 = vld [vmem:[#allocation7 + $0x38] sm:$0xff]   ;;  %v323_v44 = vlaneseq }
 0x117   :  { %v3162_v43 = vld [vmem:[#allocation7 + $0xb8] sm:$0xff]  }
 0x119   :  { %1791 = vmatpush1.bf16.msra.mxu0 %v3081_v45  ;;  %1955 = vmatpush1.bf16.msra.mxu1 %v3084_v46  ;;  %v324_v45 = vshrl.u32 %v323_v44, 7 }
 0x11a   :  { %1792 = vmatprep.subr.bf16.mxu0 %v3089_v47  ;;  %1956 = vmatprep.subr.bf16.mxu1 %v3092_v48  ;;  %v321_v48 = vld [vmem:[%s3373_s2] sm:$0xf] }
 0x11b   :  { %v325_v46 = vsub.s32 0, %v324_v45  ;;  %v333_v47 = vsub.s32 2, %v324_v45 }
 0x11d   :  { %1793 = vmatpush1.bf16.msra.mxu0 %v3087_v49  ;;  %1957 = vmatpush1.bf16.msra.mxu1 %v3090_v50  ;;  %v329_v49 = vsub.s32 1, %v324_v45  ;;  %v337_v50 = vsub.s32 3, %v324_v45 }
 0x11e   :  { %1794 = vmatprep.subr.bf16.mxu0 %v3095_v51  ;;  %1958 = vmatprep.subr.bf16.mxu1 %v3098_v52  ;;  %v326_v51 = vrot.slane %v321_v48, %v325_v46  ;;  %v334_v52 = vrot.slane %v321_v48, %v333_v47 }
 0x121   :  { %1795 = vmatpush1.bf16.msra.mxu0 %v3093_v53  ;;  %1959 = vmatpush1.bf16.msra.mxu1 %v3096_v54  ;;  %v330_v53 = vrot.slane %v321_v48, %v329_v49  ;;  %v338_v54 = vrot.slane %v321_v48, %v337_v50 }
 0x122   :  { %1796 = vmatprep.subr.bf16.mxu0 %v3101_v55  ;;  %1960 = vmatprep.subr.bf16.mxu1 %v3104_v56 }
 0x125   :  { %1797 = vmatpush1.bf16.msra.mxu0 %v3099_v57  ;;  %1961 = vmatpush1.bf16.msra.mxu1 %v3102_v58 }
 0x126   :  { %1798 = vmatprep.subr.bf16.mxu0 %v3107_v59  ;;  %1962 = vmatprep.subr.bf16.mxu1 %v3110_v60 }
 0x129   :  { %1799 = vmatpush1.bf16.msra.mxu0 %v3105_v61  ;;  %1963 = vmatpush1.bf16.msra.mxu1 %v3108_v62 }
 0x12a   :  { %1800 = vmatprep.subr.bf16.mxu0 %v3113_v63  ;;  %1964 = vmatprep.subr.bf16.mxu1 %v3116_v0 }
 0x12d   :  { %1801 = vmatpush1.bf16.msra.mxu0 %v3111_v1  ;;  %1965 = vmatpush1.bf16.msra.mxu1 %v3114_v2 }
 0x12e   :  { %1802 = vmatprep.subr.bf16.mxu0 %v3119_v3  ;;  %1966 = vmatprep.subr.bf16.mxu1 %v3122_v4 }
 0x131   :  { %1803 = vmatpush1.bf16.msra.mxu0 %v3117_v5  ;;  %1967 = vmatpush1.bf16.msra.mxu1 %v3120_v6 }
 0x132   :  { %1804 = vmatprep.subr.bf16.mxu0 %v3125_v7  ;;  %1968 = vmatprep.subr.bf16.mxu1 %v3128_v8 }
 0x135   :  { %1805 = vmatpush1.bf16.msra.mxu0 %v3123_v9  ;;  %1969 = vmatpush1.bf16.msra.mxu1 %v3126_v10 }
 0x136   :  { %2659 = vmatprep.subr.bf16.mxu0 %v3131_v12  ;;  %2681 = vmatprep.subr.bf16.mxu1 %v3132_v13 }
 0x138   :  { %1807 = vmatmul.mubr.bf16.vlgmr.msra.gmra.mrb[0].mxu0 %v2367_v15  ;;  %1971 = vmatmul.mubr.bf16.vlgmr.msra.gmra.mrb[0].mxu1 %v2367_v15 }
 0x139   :  { %2660 = vmatpush3.bf16.msra.mxu0 %v3133_v16  ;;  %2682 = vmatpush3.bf16.msra.mxu1 %v3134_v17 }
 0x13a   :  { %2661 = vmatprep.subr.bf16.mxu0 %v3135_v18  ;;  %2683 = vmatprep.subr.bf16.mxu1 %v3136_v19  ;;  %v2625_v19 = vld [vmem:[%s3375_s4] ss:$0 sm:$0xff]  ;;  %s3233_s4 = scalar_lea.vmem %s2352_s9, 128 }
 0x13b   :  { %p3234_p10 = scmp.ne.s32.totalorder %s2352_s9, %s3233_s4  ;;  %p3239_p12 = scmp.lt.s32.totalorder %s3233_s4, %s3233_s4 }
 0x13d   :  { %2662 = vmatpush3.bf16.msra.mxu0 %v3137_v20  ;;  %2684 = vmatpush3.bf16.msra.mxu1 %v3138_v21  ;;  %p3240_p13 = por %p3239_p12, %p3238_p11 }
 0x13e   :  { %2663 = vmatprep.subr.bf16.mxu0 %v3139_v11  ;;  %2685 = vmatprep.subr.bf16.mxu1 %v3140_v22 }
 0x13f   :  { %p3241_p0 = pnand %p3240_p13, %p3234_p10 }
 0x141   :  { %2664 = vmatpush3.bf16.msra.mxu0 %v3141_v14  ;;  %2686 = vmatpush3.bf16.msra.mxu1 %v3142_v23 }
 0x142   :  { %2665 = vmatprep.subr.bf16.mxu0 %v3143_v24  ;;  %2687 = vmatprep.subr.bf16.mxu1 %v3144_v25 }
 0x145   :  { %2666 = vmatpush3.bf16.msra.mxu0 %v3145_v26  ;;  %2688 = vmatpush3.bf16.msra.mxu1 %v3146_v27 }
 0x146   :  { %2667 = vmatprep.subr.bf16.mxu0 %v3147_v28  ;;  %2689 = vmatprep.subr.bf16.mxu1 %v3148_v29 }
 0x149   :  { %2668 = vmatpush3.bf16.msra.mxu0 %v3149_v30  ;;  %2690 = vmatpush3.bf16.msra.mxu1 %v3150_v31 }
 0x14a   :  { %2669 = vmatprep.subr.bf16.mxu0 %v3151_v32  ;;  %2691 = vmatprep.subr.bf16.mxu1 %v3152_v33 }
 0x14d   :  { %2670 = vmatpush3.bf16.msra.mxu0 %v3153_v34  ;;  %2692 = vmatpush3.bf16.msra.mxu1 %v3154_v35 }
 0x14e   :  { %2671 = vmatprep.subr.bf16.mxu0 %v3155_v36  ;;  %2693 = vmatprep.subr.bf16.mxu1 %v3156_v37 }
 0x151   :  { %2672 = vmatpush3.bf16.msra.mxu0 %v3157_v38  ;;  %2694 = vmatpush3.bf16.msra.mxu1 %v3158_v39 }
 0x152   :  { %2673 = vmatprep.subr.bf16.mxu0 %v3159_v40  ;;  %2695 = vmatprep.subr.bf16.mxu1 %v3160_v41 }
 0x155   :  { %2674 = vmatpush3.bf16.msra.mxu0 %v3161_v42  ;;  %2696 = vmatpush3.bf16.msra.mxu1 %v3162_v43 }
 0x20b   :  { %v1808_v55 = vpop.f32.mrb[0].mxu0  ;;  %v1972_v56 = vpop.f32.mrb[0].mxu1 }
 0x20c   :  { %v2703_v57 = vadd.f32 %v1808_v55, %v326_v51  ;;  %v2705_v58 = vadd.f32 %v1972_v56, %v334_v52  ;;  %v1810_v59 = vpop.f32.mrb[1].mxu0  ;;  %v1974_v60 = vpop.f32.mrb[1].mxu1 }
 0x20d   :  { %v2704_v61 = vadd.f32 %v1810_v59, %v330_v53  ;;  %v2706_v62 = vadd.f32 %v1974_v60, %v338_v54  ;;  %v1812_v63 = vpop.f32.mrb[2].mxu0  ;;  %v1976_v0 = vpop.f32.mrb[2].mxu1 }
 0x20e   :  { %vm1979_vm0 = vcmp.ge.f32.partialorder %v2703_v57, 0.0  ;;  %v1983_v1 = vmul.f32 0.2, %v2703_v57  ;;  %vm1981_vm1 = vcmp.ge.f32.partialorder %v2705_v58, 0.0  ;;  %v1985_v2 = vmul.f32 0.2, %v2705_v58 }
 0x20f   :  { %vm1980_vm2 = vcmp.ge.f32.partialorder %v2704_v61, 0.0  ;;  %v1984_v3 = vmul.f32 0.2, %v2704_v61  ;;  %vm1982_vm3 = vcmp.ge.f32.partialorder %v2706_v62, 0.0  ;;  %v1986_v4 = vmul.f32 0.2, %v2706_v62 }
 0x210   :  { %v1987_v5 = vsel %vm1979_vm0, %v2703_v57, %v1983_v1  ;;  %v1989_v6 = vsel %vm1981_vm1, %v2705_v58, %v1985_v2  ;;  %v1813_v7 = vpop.f32.mrb[3].mxu0  ;;  %v1977_v8 = vpop.f32.mrb[3].mxu1 }
 0x211   :  { %v1988_v9 = vsel %vm1980_vm2, %v2704_v61, %v1984_v3  ;;  %v1990_v10 = vsel %vm1982_vm3, %v2706_v62, %v1986_v4  ;;  %v1991_v15 = vpack.c.bf16 %v1987_v5, %v1987_v5  ;;  %v1993_v16 = vpack.c.bf16 %v1989_v6, %v1989_v6 }
 0x212   :  { %v1992_v12 = vpack.c.bf16 %v1988_v9, %v1988_v9  ;;  %v1994_v13 = vpack.c.bf16 %v1990_v10, %v1990_v10 }
 0x214   :  { %2290 = vmatprep.mubr.bf16.mxu0 %v1992_v12  ;;  %2330 = vmatprep.mubr.bf16.mxu1 %v1994_v13 }
 0x215   :  { %2291 = vmatmul.mubr.bf16.vlgmr.msra.gmra.mrb[4].mxu0 %v1991_v15  ;;  %2331 = vmatmul.mubr.bf16.vlgmr.msra.gmra.mrb[4].mxu1 %v1993_v16 }
 0x2e8   :  { %v2675_v17 = vpop.f32.mrb[4].mxu0  ;;  %v2697_v18 = vpop.f32.mrb[4].mxu1 }
 0x2e9   :  { %v2676_v20 = vpop.f32.mrb[5].mxu0  ;;  %v2698_v21 = vpop.f32.mrb[5].mxu1 }
 0x2ea   :  { %v2677_v11 = vadd.f32 %v2676_v20, %v2675_v17  ;;  %v2699_v22 = vadd.f32 %v2698_v21, %v2697_v18  ;;  %v2678_v14 = vpop.f32.mrb[6].mxu0  ;;  %v2700_v23 = vpop.f32.mrb[6].mxu1 }
 0x2eb   :  { %v2679_v24 = vpop.f32.mrb[7].mxu0  ;;  %v2701_v25 = vpop.f32.mrb[7].mxu1 }
 0x2ec   :  { %v2293_v26 = vadd.f32 %v2677_v11, %v2625_v19 }
 0x2ee   :  { %v2333_v27 = vadd.f32 %v2699_v22, %v2293_v26 }
 0x2f0   :  { %v2658_v28 = vmul.f32 -1.442695, %v2333_v27 }
 0x2f2   :  { %3163 = vpow2.f32 %v2658_v28 }
 0x2fc   :  { %v3164_v29 = vpop.eup %3163 }
 0x2fd   :  { %v2341_v30 = vadd.f32 1.0, %v3164_v29 }
 0x2ff   :  { %3165 = vrcp.f32 %v2341_v30 }
 0x309   :  { %v3166_v31 = vpop.eup %3165 }
 0x30a   :  { %2344 = vst [vmem:[#allocation8] sm:$0xff] %v3166_v31 }
 0x30b   :  { %3244 = shalt.err (!%p3241_p0)
}
 0x30c   :  { %s3245_s12 = scalar_lea.hbm %s3376_s5, 128 }
 0x30d   :  { %p3246_p1 = scmp.ne.s32.totalorder %s3376_s5, %s3245_s12  ;;  %p3249_p2 = scmp.lt.u32.totalorder %s3245_s12, %s3376_s5 }
 0x30f   :  { %p3251_p3 = pnand %p3249_p2, %p3246_p1 }
 0x311   :  { %3254 = shalt.err (!%p3251_p3)
}
 0x312   :  { %2354 = dma.vmem_to_hbm [thread:$0]  %s2352_s9, 128, %s3376_s5, [#allocation4]  }
 0x313   :  { %3259 = dma.done.wait [#allocation4], 128  }
 0x314   :  { %3260 = vsyncadd [#allocation4], 4294967168 }
 0x315   :  { %2358 = vsyncpa [#allocation3], 1 }
 0x316   :  { %2359 = vsyncpa [#allocation6], 1 }
 0x317   :  { %2360 = vsyncpa [#allocation4], 1 }

</bundles_post_ra>
